<compile_context>
chip_gen: v7x
topology: tpu7x:2x2x1
jax: 0.10.0
libtpu: 0.0.40
codegen_flags: <defaults>
</compile_context>

<pallas_src>
import math

import jax
import jax.numpy as jnp
import numpy as np
from jax.experimental import pallas as pl
from jax.experimental.pallas import tpu as pltpu


_MAX_TILE_PIXELS = 65536          # upper bound on pixels per block (multiple of 128)
_VMEM_FALLBACK_BYTES = 64 * 1024 * 1024   # conservative (v7x-sized) fallback


def _vmem_capacity_bytes():
    """Physical VMEM of the current TPU generation (conservative fallback)."""
    try:
        return int(pltpu.get_tpu_info().vmem_capacity_bytes)
    except Exception:
        return _VMEM_FALLBACK_BYTES


def _pick_tile(hw, c, itemsize, has_weight, emit_loss, budget):
    """Largest pixel tile (multiple of 128, or the full hw) within `budget`.

    Counts double-buffered IO, named scratch AND the live in-kernel f32
    temporaries (x, exp(x-m), the one-hot select result, ...), which dominate
    for large C and would otherwise spill / VMEM-OOM once the tile is big.
    """
    io = c * itemsize + 4 + (4 if has_weight else 0) + (4 if emit_loss else 0)
    temps = 4 * (4 * c + 6)            # ~4 live (C,TP) f32 + a few (1,TP) rows
    per_px = 2 * io + temps + 2 * 4    # dbl-buffered IO + temps + acc/cacc scratch
    cap = (budget // per_px) // 128 * 128
    cap = max(128, min(_MAX_TILE_PIXELS, cap))
    return hw if hw <= cap else cap


def _make_bce_kernel(*, ignore_index, prob_thres, hw, tp, tiles_per_half,
                     n_halves, has_weight, has_cw, emit_loss):
    """Kernel specialised on (has_weight, has_cw, emit_loss, masking needs)."""
    full_tiles = hw // tp                              # tiles fully in range
    needs_mask = (n_halves * tiles_per_half) > full_tiles

    def kernel(*args):
        it = iter(args)
        logits_ref = next(it)                       # (C, TP)  native dtype
        labels_ref = next(it)                       # (1, TP)  int32
        w_ref = next(it) if has_weight else None    # (1, TP)  f32
        cw_ref = next(it) if has_cw else None       # (C, 1)   f32
        loss_ref = next(it) if emit_loss else None  # (1, TP)  f32
        sum_ref = next(it)                          # (1, 1)   f32 per (half, image)
        cnt_ref = next(it)                          # (1, 1)   f32 per (half, image)
        acc_ref = next(it)                          # (1, TP)  f32 scratch
        cacc_ref = next(it)                         # (1, TP)  f32 scratch

        h = pl.program_id(0)                        # pixel-half index
        i = pl.program_id(2)                        # tile index within the half

        @pl.when(i == 0)
        def _():
            acc_ref[...] = jnp.zeros_like(acc_ref)
            cacc_ref[...] = jnp.zeros_like(cacc_ref)

        x = logits_ref[...].astype(jnp.float32)     # (C, TP) compute in f32
        lbl = labels_ref[...]                       # (1, TP)

        # Numerically stable log-sum-exp over the class (sublane) axis.
        m = jnp.max(x, axis=0, keepdims=True)                          # (1, TP)
        lse = jnp.log(jnp.sum(jnp.exp(x - m), axis=0, keepdims=True)) + m

        # One-hot gather (no hardware gather). Single select + sublane reduce.
        cls = jax.lax.broadcasted_iota(jnp.int32, x.shape, 0)          # (C, TP)
        onehot = cls == lbl                                            # (C, TP)
        if has_cw:
            # Fused: cw[label] * (lse - x[label]) in one select + one reduce.
            nll = jnp.sum(jnp.where(onehot, cw_ref[...] * (lse - x), 0.0),
                          axis=0, keepdims=True)                       # (1, TP)
        else:
            x_l = jnp.sum(jnp.where(onehot, x, 0.0), axis=0, keepdims=True)
            nll = lse - x_l                                            # (1, TP)

        # ignore_index pixels contribute zero loss and zero count.
        valid = lbl != ignore_index
        loss = jnp.where(valid, nll, 0.0)                              # (1, TP)

        # Bootstrap threshold, applied to the (class-weighted) loss exactly
        # like the reference: loss[loss < -log(prob_thres)] = 0.
        if prob_thres is not None:
            loss = jnp.where(loss < jnp.float32(-math.log(prob_thres)), 0.0, loss)

        # Per-pixel weight applied after thresholding (weight_reduce_loss order).
        if has_weight:
            loss = loss * w_ref[...].astype(jnp.float32)

        vcnt = jnp.where(valid, 1.0, 0.0)                              # (1, TP)

        def commit(l, v):
            if emit_loss:
                loss_ref[...] = l
            acc_ref[...] += l
            cacc_ref[...] += v

        if needs_mask:
            # Only the ragged last tile (and the clamped duplicate tile of an
            # odd tile count, whose pixel offsets are all >= hw) is masked.
            g = h * tiles_per_half + i              # global tile index

            @pl.when(g < full_tiles)
            def _():
                commit(loss, vcnt)

            @pl.when(g >= full_tiles)
            def _():
                pix = g * tp + jax.lax.broadcasted_iota(jnp.int32, loss.shape, 1)
                in_r = pix < hw
                commit(jnp.where(in_r, loss, 0.0), jnp.where(in_r, vcnt, 0.0))
        else:
            commit(loss, vcnt)

        @pl.when(i == pl.num_programs(2) - 1)
        def _():
            sum_ref[...] = jnp.sum(acc_ref[...], axis=-1, keepdims=True)
            cnt_ref[...] = jnp.sum(cacc_ref[...], axis=-1, keepdims=True)

    return kernel


def _bce_pallas(logits, labels, weight, class_weight, *, ignore_index,
                prob_thres, emit_loss):
    """logits (N, C, HW) native dtype; labels (N, 1, HW) int32;
    weight None or (N, 1, HW) f32; class_weight None or (C, 1) f32.

    Returns (per_pixel_loss (N,1,HW) f32 or None,
             per-(half,image) loss sums (n_halves,N,1,1) f32,
             per-(half,image) valid counts (n_halves,N,1,1) f32).
    """
    N, C, HW = logits.shape
    has_weight = weight is not None
    has_cw = class_weight is not None
    itemsize = logits.dtype.itemsize

    # Generation-aware VMEM sizing (v5e/v6e: 128 MiB physical, v7x: 64 MiB).
    capacity = _vmem_capacity_bytes()
    budget = max(8 << 20, min(capacity // 3, 48 << 20))
    vmem_limit = int(min(capacity * 3 // 4, 112 << 20))

    TP = _pick_tile(HW, C, itemsize, has_weight, emit_loss, budget)
    num_tiles = pl.cdiv(HW, TP)

    # Pixel-half split (leading "parallel" axis) so both v7x TCs stay busy at
    # small N on the mean/sum path.  'none' reduction keeps a single half so
    # the per-pixel loss blocks are written exactly once.
    n_halves = 2 if (not emit_loss and num_tiles >= 2) else 1
    tph = pl.cdiv(num_tiles, n_halves)

    kernel = _make_bce_kernel(ignore_index=int(ignore_index),
                              prob_thres=prob_thres, hw=HW, tp=TP,
                              tiles_per_half=tph, n_halves=n_halves,
                              has_weight=has_weight, has_cw=has_cw,
                              emit_loss=emit_loss)

    last_tile = num_tiles - 1

    def data_map(h, n, i):
        g = h * tph + i
        if n_halves > 1:
            g = jnp.minimum(g, last_tile)   # duplicate tile masked in-kernel
        return (n, 0, g)

    in_specs = [
        pl.BlockSpec((None, C, TP), data_map),    # logits (classes on sublanes)
        pl.BlockSpec((None, 1, TP), data_map),    # labels (lane-dense)
    ]
    inputs = [logits, labels]
    if has_weight:
        in_specs.append(pl.BlockSpec((None, 1, TP), data_map))
        inputs.append(weight)
    if has_cw:
        in_specs.append(pl.BlockSpec((C, 1), lambda h, n, i: (0, 0)))  # resident
        inputs.append(class_weight)

    out_shape = []
    out_specs = []
    if emit_loss:
        out_shape.append(jax.ShapeDtypeStruct((N, 1, HW), jnp.float32))
        out_specs.append(pl.BlockSpec((None, 1, TP), data_map))
    out_shape.append(jax.ShapeDtypeStruct((n_halves, N, 1, 1), jnp.float32))
    out_specs.append(pl.BlockSpec((None, None, 1, 1), lambda h, n, i: (h, n, 0, 0)))
    out_shape.append(jax.ShapeDtypeStruct((n_halves, N, 1, 1), jnp.float32))
    out_specs.append(pl.BlockSpec((None, None, 1, 1), lambda h, n, i: (h, n, 0, 0)))

    bytes_px = C * itemsize + 4 + (4 if has_weight else 0) + (4 if emit_loss else 0)
    cost = pl.CostEstimate(
        flops=int(N * HW * (8 * C + 16)),
        transcendentals=int(N * HW * (C + 1)),
        bytes_accessed=int(N * HW * bytes_px + 2 * n_halves * N * 4 + C * 4),
    )

    outs = pl.pallas_call(
        kernel,
        out_shape=tuple(out_shape),
        grid_spec=pltpu.PrefetchScalarGridSpec(
            num_scalar_prefetch=0,
            grid=(n_halves, N, tph),
            in_specs=in_specs,
            out_specs=tuple(out_specs),
            scratch_shapes=[pltpu.VMEM((1, TP), jnp.float32),
                            pltpu.VMEM((1, TP), jnp.float32)],
        ),
        compiler_params=pltpu.CompilerParams(
            dimension_semantics=("parallel", "parallel", "arbitrary"),
            vmem_limit_bytes=vmem_limit),
        cost_estimate=cost,
    )(*inputs)

    if emit_loss:
        loss_pp, loss_sum, valid_cnt = outs
    else:
        loss_sum, valid_cnt = outs
        loss_pp = None
    return loss_pp, loss_sum, valid_cnt


def boostrapped_cross_entropy(pred, label, weight=None, class_weight=None,
                              reduction='mean', avg_factor=None,
                              ignore_index=-100, avg_non_ignore=False,
                              prob_thres=None):
    """Pallas implementation of mmseg's boostrapped_cross_entropy.

    pred  : (N, C, H, W) float (any float dtype; streamed in native dtype)
    label : (N, H, W) int
    weight: optional (N, H, W) per-pixel weight
    """
    pred = jnp.asarray(pred)
    N, C, H, W = pred.shape
    HW = H * W
    P = N * HW

    logits = pred.reshape(N, C, HW)                   # free, contiguous view of NCHW
    labels = jnp.asarray(label, jnp.int32).reshape(N, 1, HW)
    w = (jnp.asarray(weight, jnp.float32).reshape(N, 1, HW)
         if weight is not None else None)
    cw = (jnp.asarray(class_weight, jnp.float32).reshape(C, 1)
          if class_weight is not None else None)

    emit_loss = (reduction == 'none')
    loss_pp, partial_sum, partial_cnt = _bce_pallas(
        logits, labels, w, cw, ignore_index=ignore_index,
        prob_thres=prob_thres, emit_loss=emit_loss)

    if reduction == 'none':
        return loss_pp.reshape(N, H, W)

    loss_sum = jnp.sum(partial_sum)

    if avg_factor is None and avg_non_ignore and reduction == 'mean':
        avg_factor = jnp.sum(partial_cnt)             # counted in-kernel

    # weight_reduce_loss
    if avg_factor is None:
        if reduction == 'mean':
            # mmseg default: mean over ALL pixels (including ignored ones).
            return loss_sum / jnp.float32(P)
        return loss_sum                               # 'sum'
    else:
        if reduction == 'mean':
            return loss_sum / avg_factor
        raise ValueError('avg_factor can not be used with reduction="sum"')


class BoostrappedCrossEntropyLoss:
    """JAX/Pallas port of mmseg BoostrappedCrossEntropyLoss (forward only)."""

    def __init__(self, use_sigmoid=False, use_mask=False, reduction='mean',
                 class_weight=None, loss_weight=1.0, loss_name='loss_ce',
                 avg_non_ignore=False):
        assert use_sigmoid is False or use_mask is False
        self.use_sigmoid = use_sigmoid
        self.use_mask = use_mask
        self.reduction = reduction
        self.loss_weight = loss_weight
        self.class_weight = class_weight
        self.avg_non_ignore = avg_non_ignore
        self._loss_name = loss_name

    def __call__(self, cls_score, label, weight=None, avg_factor=None,
                 reduction_override=None, ignore_index=-100, **kwargs):
        assert reduction_override in (None, 'none', 'mean', 'sum')
        reduction = reduction_override if reduction_override else self.reduction
        loss = boostrapped_cross_entropy(
            cls_score, label, weight,
            class_weight=self.class_weight,
            reduction=reduction,
            avg_factor=avg_factor,
            avg_non_ignore=self.avg_non_ignore,
            ignore_index=ignore_index,
            **kwargs)
        return self.loss_weight * loss

    @property
    def loss_name(self):
        return self._loss_name


def _reference_jax(pred, label, weight, class_weight, reduction, avg_factor,
                   ignore_index, avg_non_ignore, prob_thres):
    """Pure-JAX reference of the same forward pass."""
    N, C, H, W = pred.shape
    x = jnp.transpose(pred, (0, 2, 3, 1)).reshape(-1, C).astype(jnp.float32)
    lbl = label.reshape(-1)
    logp = jax.nn.log_softmax(x, axis=-1)
    safe = jnp.where(lbl == ignore_index, 0, lbl).astype(jnp.int32)
    nll = -jnp.take_along_axis(logp, safe[:, None], axis=-1)[:, 0]
    cw = (jnp.asarray(class_weight, jnp.float32) if class_weight is not None
          else jnp.ones((C,), jnp.float32))
    loss = jnp.where(lbl == ignore_index, 0.0, nll * cw[safe])
    if avg_factor is None and avg_non_ignore and reduction == 'mean':
        avg_factor = jnp.sum(lbl != ignore_index).astype(jnp.float32)
    if prob_thres is not None:
        loss = jnp.where(loss < -math.log(prob_thres), 0.0, loss)
    if weight is not None:
        loss = loss * weight.reshape(-1).astype(jnp.float32)
    if reduction == 'none':
        return loss.reshape(N, H, W)
    if avg_factor is None:
        return loss.mean() if reduction == 'mean' else loss.sum()
    return loss.sum() / avg_factor


if __name__ == "__main__":
    key = jax.random.PRNGKey(0)
    k1, k2, k3, k4, k5, k6 = jax.random.split(key, 6)

    # ---- Test 1: mean reduction, class weights, bootstrap threshold --------
    N, C, H, W = 2, 4, 16, 16
    pred = jax.random.normal(k1, (N, C, H, W), dtype=jnp.float32)
    label = jax.random.randint(k2, (N, H, W), 0, C, dtype=jnp.int32)
    ignore_mask = jax.random.uniform(k3, (N, H, W)) < 0.1
    label = jnp.where(ignore_mask, jnp.int32(-100), label)

    class_weight = [1.0, 0.5, 2.0, 1.5]
    loss_mod = BoostrappedCrossEntropyLoss(
        reduction='mean', class_weight=class_weight,
        loss_weight=1.0, avg_non_ignore=True)

    out = loss_mod(pred, label, ignore_index=-100, prob_thres=0.6)
    out = jax.block_until_ready(out)
    ref = _reference_jax(pred, label, None, class_weight, 'mean', None,
                         -100, True, 0.6)
    np.testing.assert_allclose(np.asarray(out), np.asarray(ref),
                               rtol=2e-5, atol=2e-5)

    # ---- Test 2: 'none' reduction (per-pixel losses) ------------------------
    out_none = loss_mod(pred, label, ignore_index=-100,
                        reduction_override='none', prob_thres=0.6)
    out_none = jax.block_until_ready(out_none)
    assert out_none.shape == (N, H, W)
    ref_none = _reference_jax(pred, label, None, class_weight, 'none', None,
                              -100, True, 0.6)
    np.testing.assert_allclose(np.asarray(out_none), np.asarray(ref_none),
                               rtol=2e-5, atol=2e-5)

    # ---- Test 3: bf16 logits, per-pixel weight, no class weight, ragged ----
    # Force TP=128 so HW=300 exercises tiling, the pixel-half split (with a
    # duplicate masked tile), and the ragged tail mask.
    _MAX_TILE_PIXELS = 128
    N2, C2, H2, W2 = 1, 5, 15, 20
    pred2 = jax.random.normal(k4, (N2, C2, H2, W2),
                              dtype=jnp.float32).astype(jnp.bfloat16)
    label2 = jax.random.randint(k5, (N2, H2, W2), 0, C2, dtype=jnp.int32)
    ign2 = jax.random.uniform(k6, (N2, H2, W2)) < 0.15
    label2 = jnp.where(ign2, jnp.int32(255), label2)
    pix_w = jax.random.uniform(jax.random.PRNGKey(7), (N2, H2, W2),
                               dtype=jnp.float32)

    loss_mod2 = BoostrappedCrossEntropyLoss(reduction='mean', class_weight=None,
                                            loss_weight=2.0, avg_non_ignore=False)
    out2 = loss_mod2(pred2, label2, weight=pix_w, ignore_index=255,
                     prob_thres=0.5)
    out2 = jax.block_until_ready(out2)
    ref2 = 2.0 * _reference_jax(pred2, label2, pix_w, None, 'mean', None,
                                255, False, 0.5)
    np.testing.assert_allclose(np.asarray(out2), np.asarray(ref2),
                               rtol=2e-5, atol=2e-5)

    out3 = loss_mod2(pred2, label2, weight=pix_w, ignore_index=255,
                     reduction_override='sum', prob_thres=0.5)
    out3 = jax.block_until_ready(out3)
    ref3 = 2.0 * _reference_jax(pred2, label2, pix_w, None, 'sum', None,
                                255, False, 0.5)
    np.testing.assert_allclose(np.asarray(out3), np.asarray(ref3),
                               rtol=2e-5, atol=2e-5)

    # ---- Test 4: 'none' reduction across multiple tiles + ragged tail -------
    out4 = loss_mod2(pred2, label2, weight=pix_w, ignore_index=255,
                     reduction_override='none', prob_thres=0.5)
    out4 = jax.block_until_ready(out4)
    ref4 = 2.0 * _reference_jax(pred2, label2, pix_w, None, 'none', None,
                                255, False, 0.5)
    np.testing.assert_allclose(np.asarray(out4), np.asarray(ref4),
                               rtol=2e-5, atol=2e-5)
    _MAX_TILE_PIXELS = 65536

    print("KERNEL_OK")
</pallas_src>

<mosaic_0001>
module attributes {stable_mosaic.version = 11 : i64} {
  func.func @kernel(%arg0: i32, %arg1: i32, %arg2: i32, %arg3: memref<1x4x256xf32, #tpu.memory_space<vmem>>, %arg4: memref<1x1x256xi32, #tpu.memory_space<vmem>>, %arg5: memref<4x1xf32, #tpu.memory_space<vmem>>, %arg6: memref<1x1x1x1xf32, #tpu.memory_space<vmem>>, %arg7: memref<1x1x1x1xf32, #tpu.memory_space<vmem>>, %arg8: memref<1x256xf32, #tpu.memory_space<vmem>>, %arg9: memref<1x256xf32, #tpu.memory_space<vmem>>) attributes {dimension_semantics = [#tpu.dimension_semantics<parallel>, #tpu.dimension_semantics<parallel>, #tpu.dimension_semantics<arbitrary>], iteration_bounds = array<i64: 1, 2, 1>, scalar_prefetch = 0 : i64, scratch_operands = 2 : i64, tpu.core_type = #tpu.core_type<tc>, window_params = [{transform_indices = @transform_0, window_bounds = array<i64: 1, 4, 256>}, {transform_indices = @transform_1, window_bounds = array<i64: 1, 1, 256>}, {pipeline_mode = #tpu.pipeline_mode<synchronous>, transform_indices = @transform_2, window_bounds = array<i64: 4, 1>}, {transform_indices = @transform_3, window_bounds = array<i64: 1, 1, 1, 1>}, {transform_indices = @transform_4, window_bounds = array<i64: 1, 1, 1, 1>}]} {
    %c0_i32 = arith.constant 0 : i32
    %0 = arith.cmpi eq, %arg2, %c0_i32 : i32
    %1 = arith.extui %0 : i1 to i32
    %c0_i32_0 = arith.constant 0 : i32
    %2 = arith.cmpi ne, %1, %c0_i32_0 : i32
    scf.if %2 {
      %cst_26 = arith.constant 0.000000e+00 : f32
      %48 = vector.broadcast %cst_26 : f32 to vector<1x256xf32>
      %c0_27 = arith.constant 0 : index
      %c0_28 = arith.constant 0 : index
      %49 = vector.load %arg8[%c0_27, %c0_28] : memref<1x256xf32, #tpu.memory_space<vmem>>, vector<1x256xf32>
      tpu.vector_store %arg8[%c0_27, %c0_28], %48 {strides = array<i32>} : memref<1x256xf32, #tpu.memory_space<vmem>>, vector<1x256xf32>,
      %cst_29 = arith.constant 0.000000e+00 : f32
      %50 = vector.broadcast %cst_29 : f32 to vector<1x256xf32>
      %c0_30 = arith.constant 0 : index
      %c0_31 = arith.constant 0 : index
      %51 = vector.load %arg9[%c0_30, %c0_31] : memref<1x256xf32, #tpu.memory_space<vmem>>, vector<1x256xf32>
      tpu.vector_store %arg9[%c0_30, %c0_31], %50 {strides = array<i32>} : memref<1x256xf32, #tpu.memory_space<vmem>>, vector<1x256xf32>,
    } else {
    }
    %c0 = arith.constant 0 : index
    %c0_1 = arith.constant 0 : index
    %c0_2 = arith.constant 0 : index
    %3 = vector.load %arg3[%c0, %c0_1, %c0_2] : memref<1x4x256xf32, #tpu.memory_space<vmem>>, vector<1x4x256xf32>
    %4 = vector.shape_cast %3 : vector<1x4x256xf32> to vector<4x256xf32>
    %c0_3 = arith.constant 0 : index
    %c0_4 = arith.constant 0 : index
    %c0_5 = arith.constant 0 : index
    %5 = vector.load %arg4[%c0_3, %c0_4, %c0_5] : memref<1x1x256xi32, #tpu.memory_space<vmem>>, vector<1x1x256xi32>
    %6 = vector.shape_cast %5 : vector<1x1x256xi32> to vector<1x256xi32>
    %cst = arith.constant dense<0xFF800000> : vector<256xf32>
    %7 = vector.multi_reduction <maximumf>, %4, %cst [0] : vector<4x256xf32> to vector<256xf32>
    %8 = vector.shape_cast %7 : vector<256xf32> to vector<1x256xf32>
    %9 = vector.broadcast %8 : vector<1x256xf32> to vector<4x256xf32>
    %10 = arith.subf %4, %9 : vector<4x256xf32>
    %11 = math.exp %10 : vector<4x256xf32>
    %cst_6 = arith.constant dense<0.000000e+00> : vector<256xf32>
    %12 = vector.multi_reduction <add>, %11, %cst_6 [0] : vector<4x256xf32> to vector<256xf32>
    %13 = vector.shape_cast %12 : vector<256xf32> to vector<1x256xf32>
    %14 = math.log %13 : vector<1x256xf32>
    %15 = arith.addf %14, %8 : vector<1x256xf32>
    %16 = tpu.iota {dimensions = array<i32: 0>} : vector<4x256xi32>
    %17 = vector.broadcast %6 : vector<1x256xi32> to vector<4x256xi32>
    %18 = arith.cmpi eq, %16, %17 : vector<4x256xi32>
    %c0_7 = arith.constant 0 : index
    %c0_8 = arith.constant 0 : index
    %19 = vector.load %arg5[%c0_7, %c0_8] : memref<4x1xf32, #tpu.memory_space<vmem>>, vector<4x1xf32>
    %20 = vector.broadcast %15 : vector<1x256xf32> to vector<4x256xf32>
    %21 = arith.subf %20, %4 : vector<4x256xf32>
    %22 = vector.broadcast %19 : vector<4x1xf32> to vector<4x256xf32>
    %23 = arith.mulf %22, %21 : vector<4x256xf32>
    %cst_9 = arith.constant 0.000000e+00 : f32
    %24 = vector.broadcast %cst_9 : f32 to vector<4x256xf32>
    %25 = arith.select %18, %23, %24 : vector<4x256xi1>, vector<4x256xf32>
    %cst_10 = arith.constant dense<0.000000e+00> : vector<256xf32>
    %26 = vector.multi_reduction <add>, %25, %cst_10 [0] : vector<4x256xf32> to vector<256xf32>
    %27 = vector.shape_cast %26 : vector<256xf32> to vector<1x256xf32>
    %c-100_i32 = arith.constant -100 : i32
    %28 = vector.broadcast %c-100_i32 : i32 to vector<1x256xi32>
    %29 = arith.cmpi ne, %6, %28 : vector<1x256xi32>
    %cst_11 = arith.constant 0.000000e+00 : f32
    %30 = vector.broadcast %cst_11 : f32 to vector<1x256xf32>
    %31 = arith.select %29, %27, %30 : vector<1x256xi1>, vector<1x256xf32>
    %cst_12 = arith.constant 0.510825634 : f32
    %32 = vector.broadcast %cst_12 : f32 to vector<1x256xf32>
    %33 = arith.cmpf olt, %31, %32 : vector<1x256xf32>
    %cst_13 = arith.constant 0.000000e+00 : f32
    %34 = vector.broadcast %cst_13 : f32 to vector<1x256xf32>
    %35 = arith.select %33, %34, %31 : vector<1x256xi1>, vector<1x256xf32>
    %cst_14 = arith.constant 1.000000e+00 : f32
    %cst_15 = arith.constant 0.000000e+00 : f32
    %36 = vector.broadcast %cst_14 : f32 to vector<1x256xf32>
    %37 = vector.broadcast %cst_15 : f32 to vector<1x256xf32>
    %38 = arith.select %29, %36, %37 : vector<1x256xi1>, vector<1x256xf32>
    %c0_16 = arith.constant 0 : index
    %c0_17 = arith.constant 0 : index
    %39 = vector.load %arg8[%c0_16, %c0_17] : memref<1x256xf32, #tpu.memory_space<vmem>>, vector<1x256xf32>
    %40 = arith.addf %39, %35 : vector<1x256xf32>
    %c0_18 = arith.constant 0 : index
    %c0_19 = arith.constant 0 : index
    %41 = vector.load %arg8[%c0_18, %c0_19] : memref<1x256xf32, #tpu.memory_space<vmem>>, vector<1x256xf32>
    tpu.vector_store %arg8[%c0_18, %c0_19], %40 {strides = array<i32>} : memref<1x256xf32, #tpu.memory_space<vmem>>, vector<1x256xf32>,
    %c0_20 = arith.constant 0 : index
    %c0_21 = arith.constant 0 : index
    %42 = vector.load %arg9[%c0_20, %c0_21] : memref<1x256xf32, #tpu.memory_space<vmem>>, vector<1x256xf32>
    %43 = arith.addf %42, %38 : vector<1x256xf32>
    %c0_22 = arith.constant 0 : index
    %c0_23 = arith.constant 0 : index
    %44 = vector.load %arg9[%c0_22, %c0_23] : memref<1x256xf32, #tpu.memory_space<vmem>>, vector<1x256xf32>
    tpu.vector_store %arg9[%c0_22, %c0_23], %43 {strides = array<i32>} : memref<1x256xf32, #tpu.memory_space<vmem>>, vector<1x256xf32>,
    %c0_i32_24 = arith.constant 0 : i32
    %45 = arith.cmpi eq, %arg2, %c0_i32_24 : i32
    %46 = arith.extui %45 : i1 to i32
    %c0_i32_25 = arith.constant 0 : i32
    %47 = arith.cmpi ne, %46, %c0_i32_25 : i32
    scf.if %47 {
      %c0_26 = arith.constant 0 : index
      %c0_27 = arith.constant 0 : index
      %48 = vector.load %arg8[%c0_26, %c0_27] : memref<1x256xf32, #tpu.memory_space<vmem>>, vector<1x256xf32>
      %cst_28 = arith.constant dense<0.000000e+00> : vector<1xf32>
      %49 = vector.multi_reduction <add>, %48, %cst_28 [1] : vector<1x256xf32> to vector<1xf32>
      %50 = vector.shape_cast %49 : vector<1xf32> to vector<1x1xf32>
      %c0_29 = arith.constant 0 : index
      %c0_30 = arith.constant 0 : index
      %c0_31 = arith.constant 0 : index
      %c0_32 = arith.constant 0 : index
      %51 = vector.load %arg6[%c0_29, %c0_30, %c0_31, %c0_32] : memref<1x1x1x1xf32, #tpu.memory_space<vmem>>, vector<1x1x1x1xf32>
      %52 = vector.shape_cast %51 : vector<1x1x1x1xf32> to vector<1x1xf32>
      %53 = vector.shape_cast %50 : vector<1x1xf32> to vector<1x1x1x1xf32>
      tpu.vector_store %arg6[%c0_29, %c0_30, %c0_31, %c0_32], %53 {strides = array<i32>} : memref<1x1x1x1xf32, #tpu.memory_space<vmem>>, vector<1x1x1x1xf32>,
      %c0_33 = arith.constant 0 : index
      %c0_34 = arith.constant 0 : index
      %54 = vector.load %arg9[%c0_33, %c0_34] : memref<1x256xf32, #tpu.memory_space<vmem>>, vector<1x256xf32>
      %cst_35 = arith.constant dense<0.000000e+00> : vector<1xf32>
      %55 = vector.multi_reduction <add>, %54, %cst_35 [1] : vector<1x256xf32> to vector<1xf32>
      %56 = vector.shape_cast %55 : vector<1xf32> to vector<1x1xf32>
      %c0_36 = arith.constant 0 : index
      %c0_37 = arith.constant 0 : index
      %c0_38 = arith.constant 0 : index
      %c0_39 = arith.constant 0 : index
      %57 = vector.load %arg7[%c0_36, %c0_37, %c0_38, %c0_39] : memref<1x1x1x1xf32, #tpu.memory_space<vmem>>, vector<1x1x1x1xf32>
      %58 = vector.shape_cast %57 : vector<1x1x1x1xf32> to vector<1x1xf32>
      %59 = vector.shape_cast %56 : vector<1x1xf32> to vector<1x1x1x1xf32>
      tpu.vector_store %arg7[%c0_36, %c0_37, %c0_38, %c0_39], %59 {strides = array<i32>} : memref<1x1x1x1xf32, #tpu.memory_space<vmem>>, vector<1x1x1x1xf32>,
    } else {
    }
    return
  }
  func.func @transform_0(%arg0: i32, %arg1: i32, %arg2: i32) -> (i32, i32, i32) {
    %c1_i32 = arith.constant 1 : i32
    %0 = arith.muli %arg0, %c1_i32 : i32
    %1 = arith.addi %0, %arg2 : i32
    %c0_i32 = arith.constant 0 : i32
    %c0_i32_0 = arith.constant 0 : i32
    return %arg1, %c0_i32, %1 : i32, i32, i32
  }
  func.func @transform_1(%arg0: i32, %arg1: i32, %arg2: i32) -> (i32, i32, i32) {
    %c1_i32 = arith.constant 1 : i32
    %0 = arith.muli %arg0, %c1_i32 : i32
    %1 = arith.addi %0, %arg2 : i32
    %c0_i32 = arith.constant 0 : i32
    %c0_i32_0 = arith.constant 0 : i32
    return %arg1, %c0_i32, %1 : i32, i32, i32
  }
  func.func @transform_2(%arg0: i32, %arg1: i32, %arg2: i32) -> (i32, i32) {
    %c0_i32 = arith.constant 0 : i32
    %c0_i32_0 = arith.constant 0 : i32
    %c0_i32_1 = arith.constant 0 : i32
    return %c0_i32, %c0_i32_0 : i32, i32
  }
  func.func @transform_3(%arg0: i32, %arg1: i32, %arg2: i32) -> (i32, i32, i32, i32) {
    %c0_i32 = arith.constant 0 : i32
    %c0_i32_0 = arith.constant 0 : i32
    %c0_i32_1 = arith.constant 0 : i32
    return %arg0, %arg1, %c0_i32, %c0_i32_0 : i32, i32, i32, i32
  }
  func.func @transform_4(%arg0: i32, %arg1: i32, %arg2: i32) -> (i32, i32, i32, i32) {
    %c0_i32 = arith.constant 0 : i32
    %c0_i32_0 = arith.constant 0 : i32
    %c0_i32_1 = arith.constant 0 : i32
    return %arg0, %arg1, %c0_i32, %c0_i32_0 : i32, i32, i32, i32
  }
}

</mosaic_0001>

<bundles_post_ra>
// kernel: tpu_custom_call.1
= control target key start
LH: loop header
LB: loop body
LE: loop exit
PB: predicated region body
PF: predicated region fallthrough
CT: control target
= control target key end

     0   :  { %10 = vsyncpa [#allocation5], 0  ;;  %s1016_s0 = inlined_call_operand.hbm [shape: f32[2,4,256], index: 0, kind: input, shape index: {}]   ;;  %s1017_s1 = inlined_call_operand.vmem [shape: s32[2,1,256], index: 1, kind: input, shape index: {}]   ;;  %s1018_s2 = inlined_call_operand.vmem [shape: f32[4,1], index: 2, kind: input, shape index: {}]   ;;  %s1019_s3 = inlined_call_operand.vmem [shape: f32[1,2,1,1], index: 3, kind: output, shape index: {0}]   ;;  %s1020_s4 = inlined_call_operand.vmem [shape: f32[1,2,1,1], index: 4, kind: output, shape index: {1}]  }
   0x1   :  { %12 = vsyncpa [#allocation5 + $0x1], 0  ;;  %s817_s15 = smov 0   ;;  %s819_s16 = smov 0  }
   0x2   :  { %s821_s17 = smov 0   ;;  %s823_s18 = smov 0  }
   0x3   :  { %s825_s19 = smov 0   ;;  %s827_s20 = smov 0  }
   0x4 LB: > { %s627_s21 = sadd.s32 4294967295, %s786_s20   ;;  %s33_s22 = sadd.s32 1, %s782_s19  ;;  %s786_s20 = sphi %s827_s20, %s18_s20   ;;  %s782_s19 = sphi %s825_s19, %s1036_s19   ;;  %s778_s18 = sphi %s823_s18, %s1035_s18   ;;  %s774_s17 = sphi %s821_s17, %s1034_s17   ;;  %s770_s16 = sphi %s819_s16, %s1033_s16   ;;  %s766_s15 = sphi %s817_s15, %s1032_s15  }
   0x5   : > { %p35_p0 = scmp.ge.s32.totalorder %s33_s22, 2  ;;  %s48_s23 = sadd.s32 1, %s774_s17 }
   0x6   : > { %p55_p1 = scmp.ne.s32.totalorder %s774_s17, %s770_s16  ;;  %p56_p2 = scmp.eq.s32.totalorder %s786_s20, 0 }
   0x7   : > { %s1038_s22 = smov (%p35_p0, %s33_s22), 0  ;;  %p61_p4 = scmp.ne.s32.totalorder %s770_s16, %s766_s15 }
   0x8   : > { %p853_p3 = por %p56_p2, %p55_p1  ;;  %s43_s25 = ssub.s32 %s782_s19, %s1038_s22 }
   0x9   : > { %p62_p5 = scmp.eq.s32.totalorder %s627_s21, 0  ;;  %p46_p6 = scmp.eq.s32.totalorder %s43_s25, 0 }
   0xa   : > { %p646_p8 = scmp.lt.s32.totalorder %s786_s20, 2  ;;  %s195_s28 = sand.u32 1, %s774_s17  }
   0xb   : > { %p860_p7 = por %p62_p5, %p61_p4  ;;  %s639_s29 = sshll.u32 %s782_s19, 7 }
   0xc   : > { %s866_s27 = scalar_select %p46_p6, %s774_s17, %s48_s23  }
   0xd   : > { %s631_s30 = sshll.u32 %s195_s28, 3  ;;  %s873_s7 = scalar_lea.hbm %s1016_s0, %s639_s29 }
   0xe   : > { %s199_s8 = scalar_lea.vmem [#allocation4], %s631_s30  ;;  %p877_p9 = pnand %p646_p8, %p853_p3 }
   0xf   : > { %s210_s9 = sshll.u32 %s199_s8, 4  ;;  %s196_s11 = scalar_lea.sflag [#allocation5], %s195_s28  ;;  %s881_s9 = int_to_ptr.vmem [resolvable:$true] %s210_s9 }
  0x10   : > { %s706_s12 = scalar_lea.hbm %s873_s7, 128  ;;  %p708_p13 = pneg %p877_p9 }
  0x11   : > { %p707_p12 = scmp.ne.s32.totalorder %s873_s7, %s706_s12  ;;  %s711_s15 = scalar_lea.hbm %s1016_s0, 256 }
  0x12   : > { %p712_p2 = scmp.lt.u32.totalorder %s873_s7, %s1016_s0  ;;  %p713_p3 = scmp.lt.u32.totalorder %s711_s15, %s706_s12 }
  0x13   : > { %p709_p0 = pnand %p708_p13, %p707_p12  ;;  %p715_p5 = scmp.lt.u32.totalorder %s706_s12, %s873_s7 }
  0x14   : > { %p714_p4 = por %p713_p3, %p712_p2 }
  0x15   : > { %p710_p1 = pneg %p709_p0 }
  0x16   : > { %p716_p6 = por %p715_p5, %p714_p4 }
  0x18   : > { %p717_p8 = pnand %p716_p6, %p710_p1 }
  0x1a   : > { %720 = shalt.err (!%p717_p8)
}
  0x1b   : > { %s721_s24 = scalar_lea.vmem %s881_s9, 128  ;;  %s788_s25 = smov [#allocation4]  }
  0x1c   : > { %p722_p12 = scmp.ne.s32.totalorder %s881_s9, %s721_s24  ;;  %s726_s28 = sshll.u32 %s788_s25, 4  ;;  %s727_s28 = int_to_ptr.vmem [resolvable:$false] %s726_s28 }
  0x1d   : > { %s728_s29 = scalar_lea.vmem %s727_s28, 256  ;;  %p729_p11 = scmp.lt.s32.totalorder %s881_s9, %s727_s28 }
  0x1e   : > { %p724_p0 = pnand %p722_p12, %p708_p13  ;;  %p730_p2 = scmp.lt.s32.totalorder %s728_s29, %s721_s24 }
  0x20   : > { %p725_p10 = pneg %p724_p0  ;;  %p731_p3 = por %p730_p2, %p729_p11 }
  0x22   : > { %p732_p4 = pnand %p731_p3, %p725_p10 }
  0x24   : > { %735 = shalt.err (!%p732_p4)
}
  0x25   : > { %645 = dma.hbm_to_vmem [thread:$0]  (!%p877_p9), %s873_s7, 128, %s881_s9, %s196_s11  }
  0x26   : > { %p1024_p1 = scmp.lt.s32.totalorder %s786_s20, 3  ;;  %p1025_p5 = scmp.ge.s32.totalorder %s786_s20, 1 }
  0x28   : > { %p230_p13 = pnand %p1025_p5, %p1024_p1 }
  0x29   : > { %s235_s30 = sand.u32 (!%p230_p13), 1, %s770_s16  }
  0x2a   : > { %233 = sbr.rel (%p230_p13) target bundleno = 363 (0x16b), region = 32  ;;  %s635_s5 = sshll.u32 (!%p230_p13), %s235_s30, 3 }
  0x2b   : > { %s236_s6 = scalar_lea.sflag (!%p230_p13), [#allocation5], %s235_s30  ;;  %s239_s8 = scalar_lea.vmem (!%p230_p13), [#allocation4], %s635_s5 }
  0x31   : > { %761 = dma.done.wait (%p860_p7), %s236_s6, 128  }
  0x32   : > { %763 = vsyncadd (%p860_p7), %s236_s6, 4294967168  ;;  %p286_p10 = scmp.lt.s32.totalorder %s778_s18, 1  ;;  %v313_v0 = vlaneseq  ;;  %v789_v1 = vmov 0   ;;  %v790_v4 = vmov 0.0   ;;  %v381_v7 = vld [vmem:[%s1018_s2] sm:$0xf] }
  0x33   : > { %698 = vset.pattern.permute.xlu0 %v789_v1  ;;  %v319_v13 = vld [vmem:[%s239_s8] sm:$0xff]  ;;  %vm324_vm3 = vcmask 1043456   ;;  %vm455_vm5 = vcmask 1040384   ;;  %vm461_vm7 = vcmask 0  }
  0x34   : > { %s1040_s18 = smov (!%p286_p10, %s778_s18), 1  ;;  %vm923_vm0 = vcmp.lt.s32.totalorder %v313_v0, 256  ;;  %v927_v3 = vshrl.u32 %v313_v0, 7  ;;  %386 = vperm.xlu0 %698, %v381_v7   ;;  %v322_v14 = vcombine.high %v319_v13, %v319_v13  ;;  %v325_v15 = vsel %vm324_vm3, %v319_v13, -inf }
  0x35   : > { %317 = vst.msk [vmem:[#allocation2] sm:$0x3] %vm923_vm0, %v790_v4  ;;  %318 = vst.msk [vmem:[#allocation3] sm:$0x3] %vm923_vm0, %v790_v4  ;;  %s636_s26 = sshll.u32 %s1040_s18, 1  ;;  %v326_v17 = vrot.slane %v325_v15, 4  ;;  %s308_s15 = scalar_lea.vmem %s1020_s4, %s1040_s18 }
  0x36   : > { %v935_v5 = vsub.s32 0, %v927_v3  ;;  %v938_v6 = vsub.s32 1, %v927_v3  ;;  %s292_s10 = scalar_lea.vmem %s1017_s1, %s636_s26  ;;  %v332_v16 = vsel %vm324_vm3, %v322_v14, -inf  ;;  %s301_s24 = scalar_lea.vmem %s1019_s3, %s1040_s18 }
  0x37   : > { %v946_v8 = vld [vmem:[%s292_s10] sm:$0x3]  ;;  %v333_v18 = vrot.slane %v332_v16, 4  ;;  %v327_v22 = vmax.f32 %v325_v15, %v326_v17 }
  0x38   : > { %v374_v9 = vrot.slane %v946_v8, %v935_v5  ;;  %v378_v10 = vrot.slane %v946_v8, %v938_v6  ;;  %vm407_vm4 = vcmp.ne.s32.totalorder %v946_v8, 4294967196 }
  0x39   : > { %v429_v19 = vsel %vm407_vm4, 1.0, %v790_v4  ;;  %v334_v23 = vmax.f32 %v332_v16, %v333_v18  ;;  %v328_v24 = vrot.slane %v327_v22, 2 }
  0x3a   : > { %vm953_vm1 = vcmp.eq.s32.totalorder %v927_v3, %v374_v9  ;;  %vm958_vm2 = vcmp.eq.s32.totalorder %v927_v3, %v378_v10 }
  0x3b   : > { %v335_v25 = vrot.slane %v334_v23, 2  ;;  %v329_v27 = vmax.f32 %v327_v22, %v328_v24 }
  0x3c   : > { %v437_v20 = vld [vmem:[#allocation3] sm:$0x3] }
  0x3d   : > { %v438_v21 = vadd.f32 %v437_v20, %v429_v19  ;;  %v336_v28 = vmax.f32 %v334_v23, %v335_v25  ;;  %v330_v34 = vrot.slane %v329_v27, 1  ;;  %v791_v19 = vmov 1966171168  }
  0x3e   : > { %v412_v20 = vunpack.c.l.s4 %v791_v19 }
  0x3f   : > { %439 = vst.msk [vmem:[#allocation3] sm:$0x3] %vm923_vm0, %v438_v21  ;;  %v337_v35 = vrot.slane %v336_v28, 1  ;;  %v331_v36 = vmax.f32 %v329_v27, %v330_v34 }
  0x40   : > { %v413_v23 = vunpack.c.0.s8 %v412_v20 }
  0x41   : > { %v338_v37 = vmax.f32 %v336_v28, %v337_v35 }
  0x42   : > { %v416_v12 = vsub.s32 %v413_v23, %v927_v3 }
  0x43   : > { %v341_v38 = vcombine.low %v331_v36, %v338_v37 }
  0x45   : > { %v343_v39 = vsub.f32 %v319_v13, %v341_v38 }
  0x46   : > { %v463_v26 = vld [vmem:[#allocation3] sm:$0x3] }
  0x47   : > { %v468_v29 = vrot.slane %v463_v26, %v935_v5  ;;  %v472_v30 = vrot.slane %v463_v26, %v938_v6  ;;  %v344_v40 = vmul.f32 1.442695, %v343_v39 }
  0x49   : > { %v475_v31 = vsel %vm455_vm5, %v468_v29, 0.0  ;;  %v476_v32 = vsel %vm455_vm5, %v472_v30, 0.0  ;;  %700 = vpow2.f32 %v344_v40 }
  0x4a   : > { %v477_v33 = vadd.f32 %v476_v32, %v475_v31 }
  0x4c   : > { %478 = vadd.xlane.f32.xlu1 %v477_v33  ;;  %v430_v33 = vld [vmem:[#allocation2] sm:$0x3] }
  0x53   : > { %v701_v41 = vpop.eup %700 }
  0x54   : > { %v347_v42 = vcombine.high %v701_v41, %v701_v41  ;;  %v349_v43 = vsel %vm324_vm3, %v701_v41, 0.0 }
  0x55   : > { %v350_v45 = vrot.slane %v349_v43, 4 }
  0x56   : > { %v356_v44 = vsel %vm324_vm3, %v347_v42, 0.0 }
  0x57   : > { %v357_v46 = vrot.slane %v356_v44, 4  ;;  %v351_v47 = vadd.f32 %v350_v45, %v349_v43 }
  0x59   : > { %v358_v48 = vadd.f32 %v357_v46, %v356_v44  ;;  %v352_v49 = vrot.slane %v351_v47, 2 }
  0x5b   : > { %v359_v50 = vrot.slane %v358_v48, 2  ;;  %v353_v51 = vadd.f32 %v352_v49, %v351_v47 }
  0x5d   : > { %v360_v52 = vadd.f32 %v359_v50, %v358_v48  ;;  %v354_v53 = vrot.slane %v353_v51, 1 }
  0x5f   : > { %v361_v54 = vrot.slane %v360_v52, 1  ;;  %v355_v55 = vadd.f32 %v354_v53, %v353_v51 }
  0x61   : > { %v362_v56 = vadd.f32 %v361_v54, %v360_v52  ;;  %702 = vlog2.f32 %v355_v55 }
  0x63   : > { %704 = vlog2.f32 %v362_v56 }
  0x6b   : > { %v703_v57 = vpop.eup %702 }
  0x6c   : > { %v364_v59 = vmul.f32 0.6931472, %v703_v57 }
  0x6d   : > { %v705_v58 = vpop.eup %704 }
  0x6e   : > { %v366_v60 = vmul.f32 0.6931472, %v705_v58  ;;  %v367_v61 = vadd.f32 %v364_v59, %v331_v36 }
  0x70   : > { %v368_v62 = vadd.f32 %v366_v60, %v338_v37  ;;  %v382_v63 = vsub.f32 %v367_v61, %v319_v13 }
  0x72   : > { %v383_v0 = vsub.f32 %v368_v62, %v322_v14 }
  0xb3   : > { %v387_v1 = vpop.permute.xlu0 %386 }
  0xb4   : > { %v389_v4 = vmul.f32 %v387_v1, %v382_v63  ;;  %v390_v7 = vmul.f32 %v387_v1, %v383_v0 }
  0xb6   : > { %v391_v9 = vsel %vm953_vm1, %v389_v4, 0.0  ;;  %v392_v10 = vsel %vm958_vm2, %v390_v7, 0.0 }
  0xb7   : > { %v393_v15 = vsel %vm324_vm3, %v391_v9, 0.0  ;;  %v400_v16 = vsel %vm324_vm3, %v392_v10, 0.0 }
  0xb8   : > { %v394_v17 = vrot.slane %v393_v15, 4  ;;  %v401_v18 = vrot.slane %v400_v16, 4 }
  0xba   : > { %v395_v21 = vadd.f32 %v394_v17, %v393_v15  ;;  %v402_v13 = vadd.f32 %v401_v18, %v400_v16 }
  0xbc   : > { %v396_v14 = vrot.slane %v395_v21, 2  ;;  %v403_v22 = vrot.slane %v402_v13, 2 }
  0xbe   : > { %v397_v24 = vadd.f32 %v396_v14, %v395_v21  ;;  %v404_v25 = vadd.f32 %v403_v22, %v402_v13 }
  0xc0   : > { %v398_v11 = vrot.slane %v397_v24, 1  ;;  %v405_v26 = vrot.slane %v404_v25, 1 }
  0xc2   : > { %v399_v27 = vadd.f32 %v398_v11, %v397_v24  ;;  %v406_v28 = vadd.f32 %v405_v26, %v404_v25 }
  0xc4   : > { %v410_v29 = vcombine.low %v399_v27, %v406_v28 }
  0xc6   : > { %v417_v30 = vrot.slane %v410_v29, %v416_v12 }
  0xc8   : > { %v424_v31 = vrot.slane %v417_v30, %v416_v12 }
  0xca   : > { %v426_v32 = vsel %vm407_vm4, %v424_v31, 0.0 }
  0xcb   : > { %vm427_vm6 = vcmp.lt.f32.partialorder %v426_v32, 0.51082563 }
  0xcc   : > { %v428_v34 = vsel %vm427_vm6, 0.0, %v426_v32 }
  0xcd   : > { %v431_v35 = vadd.f32 %v430_v33, %v428_v34 }
  0xcf   : > { %436 = vst.msk [vmem:[#allocation2] sm:$0x3] %vm923_vm0, %v431_v35 }
  0xd6   : > { %v443_v36 = vld [vmem:[#allocation2] sm:$0x3] }
  0xd7   : > { %v448_v3 = vrot.slane %v443_v36, %v935_v5  ;;  %v452_v37 = vrot.slane %v443_v36, %v938_v6 }
  0xd9   : > { %v456_v38 = vsel %vm455_vm5, %v448_v3, 0.0  ;;  %v457_v39 = vsel %vm455_vm5, %v452_v37, 0.0  ;;  %v479_v8 = vpop.xlane.xlu1 %478 }
  0xda   : > { %v458_v40 = vadd.f32 %v457_v39, %v456_v38  ;;  %480 = vst.msk [vmem:[%s308_s15] sm:$0x1] %vm461_vm7, %v479_v8 }
  0xdc   : > { %459 = vadd.xlane.f32.xlu0 %v458_v40 }
 0x169   : > { %v460_v2 = vpop.xlane.xlu0 %459 }
 0x16a   : > { %462 = vst.msk [vmem:[%s301_s24] sm:$0x1] %vm461_vm7, %v460_v2 }
 0x16b PF: > { %s18_s20 = sadd.s32 1, %s786_s20   ;;  %s1032_s15 = smov %s770_s16 }
 0x16c   : > { %p15_p7 = scmp.ge.s32.totalorder %s18_s20, 4   ;;  %s1033_s16 = smov %s774_s17 }
 0x16d   : > { %s1034_s17 = smov %s866_s27  ;;  %s1035_s18 = smov %s782_s19 }
 0x16e   : > { %s1036_s19 = smov %s1038_s22  ;;  %17 = sbr.rel (!%p15_p7) target bundleno = 4 (0x4), region = 95 }
 0x175   :  { %526 = vsyncpa [#allocation5], 1 }
 0x176   :  { %528 = vsyncpa [#allocation5 + $0x1], 1 }

</bundles_post_ra>
